<compile_context>
chip_gen: v7x
topology: tpu7x:2x2x1
jax: 0.10.0
libtpu: 0.0.40
codegen_flags: <defaults>
</compile_context>

<pallas_src>
import functools
import math

import numpy as np
import jax
import jax.numpy as jnp
from jax.experimental import pallas as pl
from jax.experimental.pallas import tpu as pltpu

LANE = 128
_DEF_TILE_M = 1024                      # lane (frame) tile
_VMEM_LIMIT = 32 * 1024 * 1024          # safe on v5e/v6e/v7x


def _round_up(x, m):
    return ((x + m - 1) // m) * m


def _choose_tile(m, max_tile=_DEF_TILE_M):
    """Lane tile (multiple of 128) giving >=2 grid steps when possible (v7x
    megacore), plus the padded total length."""
    m = max(int(m), 1)
    m_pad = _round_up(m, LANE)
    half = max(LANE, (m_pad // (2 * LANE)) * LANE)   # largest 128-multiple <= m_pad/2
    tile = min(max_tile, half)
    return tile, _round_up(m, tile)


def _cparams(n_parallel):
    return pltpu.CompilerParams(dimension_semantics=("parallel",) * n_parallel,
                                vmem_limit_bytes=_VMEM_LIMIT)


# ----------------------------------------------------------------------------
# Resample kernel: in-kernel polyphase framing, f32, lane-dense output
# ----------------------------------------------------------------------------
def _resample_kernel(kern_ref, cur_ref, halo_ref, out_ref, *, n_p, tile_c):
    # cur: (orig, tile_c) chunk tile, halo: (orig, 128) next chunks
    w = jnp.concatenate([cur_ref[0], halo_ref[0]], axis=1)   # (orig, tile_c+128)
    acc = jnp.zeros(out_ref.shape[1:], jnp.float32)          # (new_pad, tile_c)
    for p in range(n_p):
        # kern_ref[p]: (new_pad, orig);  w[:, p:p+tile_c]: (orig, tile_c)
        acc = acc + jnp.dot(kern_ref[p], w[:, p:p + tile_c],
                            preferred_element_type=jnp.float32)
    out_ref[0] = acc


def _sinc_resample_kernel_bank(orig_freq, new_freq,
                               lowpass_filter_width=6, rolloff=0.99):
    """Mirror of torchaudio._get_sinc_resample_kernel (gcd-reduced freqs)."""
    base_freq = min(orig_freq, new_freq) * rolloff
    width = math.ceil(lowpass_filter_width * orig_freq / base_freq)
    idx = np.arange(-width, width + orig_freq, dtype=np.float64) / orig_freq
    t = (np.arange(0, -new_freq, -1, dtype=np.float64)[:, None] / new_freq
         + idx[None, :])
    t *= base_freq
    t = np.clip(t, -lowpass_filter_width, lowpass_filter_width)
    window = np.cos(t * np.pi / lowpass_filter_width / 2.0) ** 2
    t *= np.pi
    scale = base_freq / orig_freq
    kernels = np.where(t == 0.0, 1.0, np.sin(t) / np.where(t == 0.0, 1.0, t))
    kernels = kernels * window * scale
    return kernels.astype(np.float32), width    # (new_freq, 2*width + orig_freq)


def resample(sig, orig_freq, new_freq, max_tile=_DEF_TILE_M):
    """sig: (B, T) float32.  torchaudio.functional.resample equivalent (f32)."""
    if orig_freq == new_freq:
        return sig
    g = math.gcd(int(orig_freq), int(new_freq))
    orig, new = int(orig_freq) // g, int(new_freq) // g
    kernels, width = _sinc_resample_kernel_bank(orig, new)       # (new, kw)
    kw = kernels.shape[1]
    n_p = -(-kw // orig)                     # taps grouped into chunks of `orig`
    assert n_p <= LANE, "halo block too small for this resampling ratio"
    new_pad = _round_up(new, 8)
    kpad = np.zeros((new_pad, n_p * orig), np.float32)
    kpad[:new, :kw] = kernels
    # kern3[p, j, r] = kernels[j, p*orig + r]
    kern3 = jnp.asarray(np.ascontiguousarray(
        kpad.reshape(new_pad, n_p, orig).transpose(1, 0, 2)))

    B, T = sig.shape
    num_frames = T // orig + 1
    tile_c, nf_pad = _choose_tile(num_frames, max_tile)
    n_tiles = nf_pad // tile_c

    # chunked, transposed signal: chs[b, r, c] = padded[b, c*orig + r]
    n_chunks = max((n_tiles + 1) * tile_c,
                   _round_up(-(-(T + 2 * width + orig) // orig), tile_c))
    pad_right = n_chunks * orig - width - T
    padded = jnp.pad(sig, ((0, 0), (width, pad_right)))
    chs = jnp.transpose(padded.reshape(B, n_chunks, orig), (0, 2, 1))

    out = pl.pallas_call(
        functools.partial(_resample_kernel, n_p=n_p, tile_c=tile_c),
        out_shape=jax.ShapeDtypeStruct((B, new_pad, nf_pad), jnp.float32),
        grid=(B, n_tiles),
        in_specs=[pl.BlockSpec((n_p, new_pad, orig), lambda b, j: (0, 0, 0)),
                  pl.BlockSpec((1, orig, tile_c), lambda b, j: (b, 0, j)),
                  pl.BlockSpec((1, orig, LANE),
                               lambda b, j: (b, 0, (j + 1) * (tile_c // LANE)))],
        out_specs=pl.BlockSpec((1, new_pad, tile_c), lambda b, j: (b, 0, j)),
        compiler_params=_cparams(2),
    )(kern3, chs, chs)

    out = out[:, :new, :num_frames]                              # (B, new, nf)
    out = jnp.transpose(out, (0, 2, 1)).reshape(B, num_frames * new)
    target_length = int(math.ceil(new * T / orig))
    return out[:, :target_length]


# ----------------------------------------------------------------------------
# VQ encode / decode kernels (lane-dense frame axis M, bf16 operands)
# ----------------------------------------------------------------------------
def _vq_encode_kernel(frames_ref, w_ref, tok_ref):
    # scores[c, m] = codebook[c] . (W_enc frame[m]) - 0.5*||codebook[c]||^2
    scores = jnp.dot(w_ref[...], frames_ref[...],
                     preferred_element_type=jnp.float32)         # (Kc, tm)
    best = jnp.max(scores, axis=0, keepdims=True)                # (1, tm)
    row = jax.lax.broadcasted_iota(jnp.int32, scores.shape, 0)
    kc = scores.shape[0]
    # first-occurrence argmax == torch.argmin(distance) tie-break
    tok_ref[...] = jnp.min(jnp.where(scores >= best, row, kc),
                           axis=0, keepdims=True).astype(jnp.int32)


def pallas_vq_encode(frames_aug, w_fused, tile_m):
    f_aug, m_pad = frames_aug.shape
    kc_pad = w_fused.shape[0]
    assert m_pad % tile_m == 0
    return pl.pallas_call(
        _vq_encode_kernel,
        out_shape=jax.ShapeDtypeStruct((1, m_pad), jnp.int32),
        grid=(m_pad // tile_m,),
        in_specs=[pl.BlockSpec((f_aug, tile_m), lambda i: (0, i)),
                  pl.BlockSpec((kc_pad, f_aug), lambda i: (0, 0))],
        out_specs=pl.BlockSpec((1, tile_m), lambda i: (0, i)),
        compiler_params=_cparams(1),
    )(frames_aug, w_fused)


def _vq_decode_kernel(tok_ref, dec_ref, out_ref):
    tok = tok_ref[...]                                           # (1, tm) int32
    kc = dec_ref.shape[1]
    onehot = (jax.lax.broadcasted_iota(jnp.int32, (kc, tok.shape[1]), 0)
              == tok).astype(jnp.bfloat16)                       # exact 0/1
    # fused embedding + decoder: (F, Kc) bf16 @ (Kc, tm) bf16 -> f32
    out_ref[...] = jnp.dot(dec_ref[...], onehot,
                           preferred_element_type=jnp.float32)


def pallas_vq_decode(tok_t, dec_t, tile_m):
    _, m_pad = tok_t.shape
    f_pad, kc_pad = dec_t.shape
    assert m_pad % tile_m == 0
    return pl.pallas_call(
        _vq_decode_kernel,
        out_shape=jax.ShapeDtypeStruct((f_pad, m_pad), jnp.float32),
        grid=(m_pad // tile_m,),
        in_specs=[pl.BlockSpec((1, tile_m), lambda i: (0, i)),
                  pl.BlockSpec((f_pad, kc_pad), lambda i: (0, 0))],
        out_specs=pl.BlockSpec((f_pad, tile_m), lambda i: (0, i)),
        compiler_params=_cparams(1),
    )(tok_t, dec_t)


# ----------------------------------------------------------------------------
# Synthetic concrete Codec (the base class is abstract)
# ----------------------------------------------------------------------------
class PallasSyntheticCodec:
    _MODES = ['encode', 'decode', 'reconstruct']

    def __init__(self, sample_rate, orig_sample_rate, mode='reconstruct',
                 frame_size=48, dim=32, codebook_size=64, seed=0):
        if mode not in self._MODES:
            raise ValueError(f'`mode` ({mode}) must be one of {self._MODES}')
        self.sample_rate = sample_rate
        self.orig_sample_rate = orig_sample_rate
        self.mode = mode
        self.frame_size = frame_size
        self.dim = dim
        self.codebook_size = codebook_size

        key = jax.random.PRNGKey(seed)
        k1, k2, k3 = jax.random.split(key, 3)
        self.w_enc = (jax.random.normal(k1, (frame_size, dim), jnp.float32)
                      / math.sqrt(frame_size))
        self.w_dec = (jax.random.normal(k2, (dim, frame_size), jnp.float32)
                      / math.sqrt(dim))
        self.codebook = jax.random.normal(k3, (codebook_size, dim), jnp.float32)

        # ---- fused / sublane-padded weights (multiples of 8 only) -----------
        self.F_pad = _round_up(frame_size, 8)
        self.F_aug = _round_up(frame_size + 1, 8)     # + ones (bias) row
        self.Kc_pad = _round_up(codebook_size, 8)

        # encode (fused): scores = [cb @ w_enc.T | -0.5||cb||^2] @ [frames ; 1]
        w_fused = jnp.zeros((self.Kc_pad, self.F_aug), jnp.float32)
        w_fused = w_fused.at[:codebook_size, :frame_size].set(
            self.codebook @ self.w_enc.T)
        bias = jnp.full((self.Kc_pad,), -1e30, jnp.float32)      # padded rows lose
        bias = bias.at[:codebook_size].set(
            -0.5 * jnp.sum(self.codebook * self.codebook, axis=-1))
        w_fused = w_fused.at[:, frame_size].set(bias)
        self.w_fused = w_fused.astype(jnp.bfloat16)

        # decode (fused): frames = (codebook @ w_dec).T @ onehot
        dec = jnp.zeros((self.F_pad, self.Kc_pad), jnp.float32)
        dec = dec.at[:frame_size, :codebook_size].set((self.codebook @ self.w_dec).T)
        self.dec_t = dec.astype(jnp.bfloat16)

    def embs(self):
        return self.codebook

    # ---- token path (synthetic stand-in for the abstract methods) ----------
    def _sig_to_toks(self, sig, length):
        # TODO(synk): `length` masking semantics are undefined by the abstract base; ignored.
        B, T = sig.shape
        F = self.frame_size
        n_frames = T // F
        M = B * n_frames
        x = sig[:, :n_frames * F].reshape(B, n_frames, F)
        frames_t = jnp.transpose(x, (2, 0, 1)).reshape(F, M)     # lane-dense M
        frames_aug = jnp.concatenate(
            [frames_t, jnp.ones((1, M), sig.dtype),
             jnp.zeros((self.F_aug - F - 1, M), sig.dtype)], axis=0)
        tile, m_pad = _choose_tile(M)
        frames_aug = jnp.pad(frames_aug,
                             ((0, 0), (0, m_pad - M))).astype(jnp.bfloat16)
        toks_t = pallas_vq_encode(frames_aug, self.w_fused, tile)  # (1, m_pad)
        return toks_t[0, :M].reshape(B, n_frames)

    def _toks_to_sig(self, toks, length):
        B, n_frames = toks.shape
        F = self.frame_size
        M = B * n_frames
        tile, m_pad = _choose_tile(M)
        tok_t = jnp.pad(toks.reshape(1, M).astype(jnp.int32),
                        ((0, 0), (0, m_pad - M)))
        frames_t = pallas_vq_decode(tok_t, self.dec_t, tile)     # (F_pad, m_pad)
        frames_t = frames_t[:F, :M].reshape(F, B, n_frames)
        return jnp.transpose(frames_t, (1, 2, 0)).reshape(B, n_frames * F)

    # ---- public API mirroring Codec ----------------------------------------
    def sig_to_toks(self, sig, length=None):
        sig = resample(sig, self.sample_rate, self.orig_sample_rate)
        if length is None:
            length = jnp.ones((sig.shape[0],), jnp.float32)
        return self._sig_to_toks(sig, length)

    def toks_to_sig(self, toks, length=None):
        if length is None:
            length = jnp.ones((toks.shape[0],), jnp.float32)
        sig = self._toks_to_sig(toks, length)
        # TODO(synk): decode -> down-resample fusion (frames kept in VMEM) not implemented.
        sig = resample(sig, self.orig_sample_rate, self.sample_rate)
        return sig

    def forward(self, x, length=None):
        if self.mode == 'encode':
            return self.sig_to_toks(x, length)
        if self.mode == 'decode':
            return self.toks_to_sig(x, length)
        toks = self.sig_to_toks(x, length)
        return self.toks_to_sig(toks, length)

    __call__ = forward


# ----------------------------------------------------------------------------
if __name__ == "__main__":
    # small, deterministic example: B=2, T=960 samples @ 16 kHz,
    # codec operating at orig_sample_rate = 24 kHz (gcd-reduced 2 <-> 3).
    B, T = 2, 960
    key = jax.random.PRNGKey(0)
    x = jax.random.normal(key, (B, T), jnp.float32) * 0.1

    codec = PallasSyntheticCodec(sample_rate=16000, orig_sample_rate=24000,
                                 mode='reconstruct')
    y = jax.block_until_ready(codec(x))
    assert y.shape == (B, T), f"unexpected output shape {y.shape}"
    assert bool(jnp.all(jnp.isfinite(y))), "non-finite output"

    # also exercise encode / decode paths once
    toks = jax.block_until_ready(codec.sig_to_toks(x))
    sig2 = jax.block_until_ready(codec.toks_to_sig(toks))
    assert toks.dtype == jnp.int32 and sig2.shape == (B, T)
    assert bool(jnp.all((toks >= 0) & (toks < codec.codebook_size)))

    print("KERNEL_OK")
</pallas_src>

<mosaic_0001>
module attributes {stable_mosaic.version = 11 : i64} {
  func.func @_resample_kernel(%arg0: i32, %arg1: i32, %arg2: memref<8x8x2xf32, #tpu.memory_space<vmem>>, %arg3: memref<1x2x256xf32, #tpu.memory_space<vmem>>, %arg4: memref<1x2x128xf32, #tpu.memory_space<vmem>>, %arg5: memref<1x8x256xf32, #tpu.memory_space<vmem>>) attributes {dimension_semantics = [#tpu.dimension_semantics<parallel>, #tpu.dimension_semantics<parallel>], iteration_bounds = array<i64: 2, 2>, scalar_prefetch = 0 : i64, scratch_operands = 0 : i64, tpu.core_type = #tpu.core_type<tc>, window_params = [{pipeline_mode = #tpu.pipeline_mode<synchronous>, transform_indices = @transform_0, window_bounds = array<i64: 8, 8, 2>}, {transform_indices = @transform_1, window_bounds = array<i64: 1, 2, 256>}, {transform_indices = @transform_2, window_bounds = array<i64: 1, 2, 128>}, {transform_indices = @transform_3, window_bounds = array<i64: 1, 8, 256>}]} {
    %c0 = arith.constant 0 : index
    %c0_0 = arith.constant 0 : index
    %c0_1 = arith.constant 0 : index
    %0 = vector.load %arg3[%c0, %c0_0, %c0_1] : memref<1x2x256xf32, #tpu.memory_space<vmem>>, vector<1x2x256xf32>
    %1 = vector.shape_cast %0 : vector<1x2x256xf32> to vector<2x256xf32>
    %c0_2 = arith.constant 0 : index
    %c0_3 = arith.constant 0 : index
    %c0_4 = arith.constant 0 : index
    %2 = vector.load %arg4[%c0_2, %c0_3, %c0_4] : memref<1x2x128xf32, #tpu.memory_space<vmem>>, vector<1x2x128xf32>
    %3 = vector.shape_cast %2 : vector<1x2x128xf32> to vector<2x128xf32>
    %4 = tpu.concatenate %1, %3 in 1 : vector<2x256xf32>, vector<2x128xf32> -> vector<2x384xf32>
    %cst = arith.constant 0.000000e+00 : f32
    %5 = vector.broadcast %cst : f32 to vector<8x256xf32>
    %c0_5 = arith.constant 0 : index
    %c0_6 = arith.constant 0 : index
    %c0_7 = arith.constant 0 : index
    %6 = vector.load %arg2[%c0_5, %c0_6, %c0_7] : memref<8x8x2xf32, #tpu.memory_space<vmem>>, vector<1x8x2xf32>
    %7 = vector.shape_cast %6 : vector<1x8x2xf32> to vector<8x2xf32>
    %8 = vector.extract_strided_slice %4 {offsets = [0, 0], sizes = [2, 256], strides = [1, 1]} : vector<2x384xf32> to vector<2x256xf32>
    %cst_8 = arith.constant dense<0.000000e+00> : vector<8x256xf32>
    %9 = tpu.matmul %7, %8, %cst_8 {dimension_numbers = #tpu.dot_dimension_numbers<[1], [0], [0], [1], [0, 0, 1, 1], [], []>} : vector<8x2xf32>, vector<2x256xf32>, vector<8x256xf32> -> vector<8x256xf32>
    %10 = arith.addf %5, %9 : vector<8x256xf32>
    %c1 = arith.constant 1 : index
    %c0_9 = arith.constant 0 : index
    %c0_10 = arith.constant 0 : index
    %11 = vector.load %arg2[%c1, %c0_9, %c0_10] : memref<8x8x2xf32, #tpu.memory_space<vmem>>, vector<1x8x2xf32>
    %12 = vector.shape_cast %11 : vector<1x8x2xf32> to vector<8x2xf32>
    %13 = vector.extract_strided_slice %4 {offsets = [0, 1], sizes = [2, 256], strides = [1, 1]} : vector<2x384xf32> to vector<2x256xf32>
    %cst_11 = arith.constant dense<0.000000e+00> : vector<8x256xf32>
    %14 = tpu.matmul %12, %13, %cst_11 {dimension_numbers = #tpu.dot_dimension_numbers<[1], [0], [0], [1], [0, 0, 1, 1], [], []>} : vector<8x2xf32>, vector<2x256xf32>, vector<8x256xf32> -> vector<8x256xf32>
    %15 = arith.addf %10, %14 : vector<8x256xf32>
    %c2 = arith.constant 2 : index
    %c0_12 = arith.constant 0 : index
    %c0_13 = arith.constant 0 : index
    %16 = vector.load %arg2[%c2, %c0_12, %c0_13] : memref<8x8x2xf32, #tpu.memory_space<vmem>>, vector<1x8x2xf32>
    %17 = vector.shape_cast %16 : vector<1x8x2xf32> to vector<8x2xf32>
    %18 = vector.extract_strided_slice %4 {offsets = [0, 2], sizes = [2, 256], strides = [1, 1]} : vector<2x384xf32> to vector<2x256xf32>
    %cst_14 = arith.constant dense<0.000000e+00> : vector<8x256xf32>
    %19 = tpu.matmul %17, %18, %cst_14 {dimension_numbers = #tpu.dot_dimension_numbers<[1], [0], [0], [1], [0, 0, 1, 1], [], []>} : vector<8x2xf32>, vector<2x256xf32>, vector<8x256xf32> -> vector<8x256xf32>
    %20 = arith.addf %15, %19 : vector<8x256xf32>
    %c3 = arith.constant 3 : index
    %c0_15 = arith.constant 0 : index
    %c0_16 = arith.constant 0 : index
    %21 = vector.load %arg2[%c3, %c0_15, %c0_16] : memref<8x8x2xf32, #tpu.memory_space<vmem>>, vector<1x8x2xf32>
    %22 = vector.shape_cast %21 : vector<1x8x2xf32> to vector<8x2xf32>
    %23 = vector.extract_strided_slice %4 {offsets = [0, 3], sizes = [2, 256], strides = [1, 1]} : vector<2x384xf32> to vector<2x256xf32>
    %cst_17 = arith.constant dense<0.000000e+00> : vector<8x256xf32>
    %24 = tpu.matmul %22, %23, %cst_17 {dimension_numbers = #tpu.dot_dimension_numbers<[1], [0], [0], [1], [0, 0, 1, 1], [], []>} : vector<8x2xf32>, vector<2x256xf32>, vector<8x256xf32> -> vector<8x256xf32>
    %25 = arith.addf %20, %24 : vector<8x256xf32>
    %c4 = arith.constant 4 : index
    %c0_18 = arith.constant 0 : index
    %c0_19 = arith.constant 0 : index
    %26 = vector.load %arg2[%c4, %c0_18, %c0_19] : memref<8x8x2xf32, #tpu.memory_space<vmem>>, vector<1x8x2xf32>
    %27 = vector.shape_cast %26 : vector<1x8x2xf32> to vector<8x2xf32>
    %28 = vector.extract_strided_slice %4 {offsets = [0, 4], sizes = [2, 256], strides = [1, 1]} : vector<2x384xf32> to vector<2x256xf32>
    %cst_20 = arith.constant dense<0.000000e+00> : vector<8x256xf32>
    %29 = tpu.matmul %27, %28, %cst_20 {dimension_numbers = #tpu.dot_dimension_numbers<[1], [0], [0], [1], [0, 0, 1, 1], [], []>} : vector<8x2xf32>, vector<2x256xf32>, vector<8x256xf32> -> vector<8x256xf32>
    %30 = arith.addf %25, %29 : vector<8x256xf32>
    %c5 = arith.constant 5 : index
    %c0_21 = arith.constant 0 : index
    %c0_22 = arith.constant 0 : index
    %31 = vector.load %arg2[%c5, %c0_21, %c0_22] : memref<8x8x2xf32, #tpu.memory_space<vmem>>, vector<1x8x2xf32>
    %32 = vector.shape_cast %31 : vector<1x8x2xf32> to vector<8x2xf32>
    %33 = vector.extract_strided_slice %4 {offsets = [0, 5], sizes = [2, 256], strides = [1, 1]} : vector<2x384xf32> to vector<2x256xf32>
    %cst_23 = arith.constant dense<0.000000e+00> : vector<8x256xf32>
    %34 = tpu.matmul %32, %33, %cst_23 {dimension_numbers = #tpu.dot_dimension_numbers<[1], [0], [0], [1], [0, 0, 1, 1], [], []>} : vector<8x2xf32>, vector<2x256xf32>, vector<8x256xf32> -> vector<8x256xf32>
    %35 = arith.addf %30, %34 : vector<8x256xf32>
    %c6 = arith.constant 6 : index
    %c0_24 = arith.constant 0 : index
    %c0_25 = arith.constant 0 : index
    %36 = vector.load %arg2[%c6, %c0_24, %c0_25] : memref<8x8x2xf32, #tpu.memory_space<vmem>>, vector<1x8x2xf32>
    %37 = vector.shape_cast %36 : vector<1x8x2xf32> to vector<8x2xf32>
    %38 = vector.extract_strided_slice %4 {offsets = [0, 6], sizes = [2, 256], strides = [1, 1]} : vector<2x384xf32> to vector<2x256xf32>
    %cst_26 = arith.constant dense<0.000000e+00> : vector<8x256xf32>
    %39 = tpu.matmul %37, %38, %cst_26 {dimension_numbers = #tpu.dot_dimension_numbers<[1], [0], [0], [1], [0, 0, 1, 1], [], []>} : vector<8x2xf32>, vector<2x256xf32>, vector<8x256xf32> -> vector<8x256xf32>
    %40 = arith.addf %35, %39 : vector<8x256xf32>
    %c7 = arith.constant 7 : index
    %c0_27 = arith.constant 0 : index
    %c0_28 = arith.constant 0 : index
    %41 = vector.load %arg2[%c7, %c0_27, %c0_28] : memref<8x8x2xf32, #tpu.memory_space<vmem>>, vector<1x8x2xf32>
    %42 = vector.shape_cast %41 : vector<1x8x2xf32> to vector<8x2xf32>
    %43 = vector.extract_strided_slice %4 {offsets = [0, 7], sizes = [2, 256], strides = [1, 1]} : vector<2x384xf32> to vector<2x256xf32>
    %cst_29 = arith.constant dense<0.000000e+00> : vector<8x256xf32>
    %44 = tpu.matmul %42, %43, %cst_29 {dimension_numbers = #tpu.dot_dimension_numbers<[1], [0], [0], [1], [0, 0, 1, 1], [], []>} : vector<8x2xf32>, vector<2x256xf32>, vector<8x256xf32> -> vector<8x256xf32>
    %45 = arith.addf %40, %44 : vector<8x256xf32>
    %c0_30 = arith.constant 0 : index
    %c0_31 = arith.constant 0 : index
    %c0_32 = arith.constant 0 : index
    %46 = vector.load %arg5[%c0_30, %c0_31, %c0_32] : memref<1x8x256xf32, #tpu.memory_space<vmem>>, vector<1x8x256xf32>
    %47 = vector.shape_cast %46 : vector<1x8x256xf32> to vector<8x256xf32>
    %48 = vector.shape_cast %45 : vector<8x256xf32> to vector<1x8x256xf32>
    tpu.vector_store %arg5[%c0_30, %c0_31, %c0_32], %48 {strides = array<i32>} : memref<1x8x256xf32, #tpu.memory_space<vmem>>, vector<1x8x256xf32>,
    return
  }
  func.func @transform_0(%arg0: i32, %arg1: i32) -> (i32, i32, i32) {
    %c0_i32 = arith.constant 0 : i32
    %c0_i32_0 = arith.constant 0 : i32
    %c0_i32_1 = arith.constant 0 : i32
    %c0_i32_2 = arith.constant 0 : i32
    return %c0_i32, %c0_i32_0, %c0_i32_1 : i32, i32, i32
  }
  func.func @transform_1(%arg0: i32, %arg1: i32) -> (i32, i32, i32) {
    %c0_i32 = arith.constant 0 : i32
    %c0_i32_0 = arith.constant 0 : i32
    return %arg0, %c0_i32, %arg1 : i32, i32, i32
  }
  func.func @transform_2(%arg0: i32, %arg1: i32) -> (i32, i32, i32) {
    %c1_i32 = arith.constant 1 : i32
    %0 = arith.addi %arg1, %c1_i32 : i32
    %c2_i32 = arith.constant 2 : i32
    %1 = arith.muli %0, %c2_i32 : i32
    %c0_i32 = arith.constant 0 : i32
    %c0_i32_0 = arith.constant 0 : i32
    return %arg0, %c0_i32, %1 : i32, i32, i32
  }
  func.func @transform_3(%arg0: i32, %arg1: i32) -> (i32, i32, i32) {
    %c0_i32 = arith.constant 0 : i32
    %c0_i32_0 = arith.constant 0 : i32
    return %arg0, %c0_i32, %arg1 : i32, i32, i32
  }
}

</mosaic_0001>

<bundles_post_ra>
// kernel: tpu_custom_call.1
= control target key start
LH: loop header
LB: loop body
LE: loop exit
PB: predicated region body
PF: predicated region fallthrough
CT: control target
= control target key end

     0   :  { %8 = vsyncpa [#allocation3], 0  ;;  %s1564_s0 = inlined_call_operand.vmem [shape: f32[8,8,2], index: 0, kind: input, shape index: {}]   ;;  %s1565_s1 = inlined_call_operand.vmem [shape: f32[2,2,768], index: 1, kind: input, shape index: {}]   ;;  %s1566_s2 = inlined_call_operand.vmem [shape: f32[2,2,768], index: 2, kind: input, shape index: {}]   ;;  %s1567_s3 = inlined_call_operand.hbm [shape: f32[2,8,512], index: 3, kind: output, shape index: {}]  }
   0x1   :  { %10 = vsyncpa [#allocation3 + $0x1], 0  ;;  %s1364_s12 = smov 0   ;;  %s1366_s13 = smov 0  }
   0x2   :  { %s1368_s14 = smov 0   ;;  %s1370_s15 = smov 0  }
   0x3   :  { %s1372_s16 = smov 0   ;;  %s1374_s17 = smov 0  }
   0x4   :  { %s1376_s18 = smov 0   ;;  %s1378_s19 = smov 0  }
   0x5 LB: > { %s1089_s20 = sadd.s32 4294967295, %s1333_s19   ;;  %s1090_s21 = sadd.s32 4294967294, %s1333_s19   ;;  %s1333_s19 = sphi %s1378_s19, %s16_s19   ;;  %s1329_s18 = sphi %s1376_s18, %s1582_s18   ;;  %s1325_s17 = sphi %s1374_s17, %s1581_s17   ;;  %s1321_s16 = sphi %s1372_s16, %s1580_s16   ;;  %s1317_s15 = sphi %s1370_s15, %s1579_s15   ;;  %s1313_s14 = sphi %s1368_s14, %s1578_s14   ;;  %s1309_s13 = sphi %s1366_s13, %s1577_s13   ;;  %s1305_s12 = sphi %s1364_s12, %s1576_s12  }
   0x6   : > { %s25_s22 = sadd.s32 1, %s1325_s17  ;;  %s28_s23 = sadd.s32 1, %s1329_s18 }
   0x7   : > { %p26_p0 = scmp.ge.s32.totalorder %s25_s22, 2  ;;  %p128_p1 = scmp.ne.s32.totalorder %s1313_s14, %s1309_s13 }
   0x8   : > { %p129_p2 = scmp.eq.s32.totalorder %s1089_s20, 3  ;;  %p134_p5 = scmp.ne.s32.totalorder %s1309_s13, %s1305_s12 }
   0x9   : > { %s1584_s22 = smov (%p26_p0, %s25_s22), 0  ;;  %s1586_s23 = smov (!%p26_p0, %s28_s23), %s1329_s18 }
   0xa   : > { %1570 = sst [smem:[#allocation5_spill]] %s1584_s22  ;;  %s114_s24 = ssub.s32 %s1325_s17, %s1584_s22 }
   0xb   : > { %p1415_p3 = por %p129_p2, %p128_p1  ;;  %p30_p4 = scmp.ge.s32.totalorder %s1586_s23, 2 }
   0xc   : > { %p135_p6 = scmp.eq.s32.totalorder %s1090_s21, 3  ;;  %p1095_p7 = scmp.ge.s32.totalorder %s1333_s19, 1 }
   0xd   : > { %s1588_s23 = smov (%p30_p4, %s1586_s23), 0  ;;  %p184_p9 = scmp.lt.s32.totalorder %s1333_s19, 5 }
   0xe   : > { %1572 = sst [smem:[#allocation6_spill]] %s1588_s23  ;;  %p1424_p8 = por %p135_p6, %p134_p5 }
   0xf   : > { %s113_s27 = ssub.s32 %s1329_s18, %s1588_s23  ;;  %s118_s28 = sadd.s32 1, %s1313_s14 }
  0x10   : > { %s115_s29 = sor.u32 %s114_s24, %s113_s27  ;;  %p185_p10 = pnand %p1095_p7, %p184_p9 }
  0x11   : > { %p116_p11 = scmp.eq.s32.totalorder %s115_s29, 0  ;;  %s1436_s4 = sshll.u32 (!%p185_p10), %s1317_s15, 1  ;;  %v1337_v2 = vmov (!%p185_p10), 0.0   ;;  %vm266_vm0 = vcmask (!%p185_p10), 1039360   ;;  %vm617_vm1 = vcmask (!%p185_p10), 1014784   ;;  %vm273_vm2 = vcmask (!%p185_p10), 1041408  }
  0x12   : > { %188 = sbr.rel (%p185_p10) target bundleno = 419 (0x1a3), region = 32  ;;  %p223_p12 = scmp.lt.s32.totalorder (!%p185_p10), %s1321_s16, 1  ;;  %342 = vmatprep.mubr.f32.mxu1 (!%p185_p10), %v1337_v2  ;;  %691 = vmatprep.mubr.f32.mxu0 (!%p185_p10), %v1337_v2  ;;  %vm269_vm3 = vcmask (!%p185_p10), 15360   ;;  %v1102_v14 = vld [vmem:[%s1564_s0 + $0x8] sm:$0xff] (!%p185_p10)  ;;  %v1117_v15 = vld [vmem:[%s1564_s0 + $0x20] sm:$0xff] (!%p185_p10)  ;;  %vm708_vm4 = vcmask (!%p185_p10), 1006592  }
  0x13   : > { %s1433_s30 = scalar_select %p116_p11, %s1313_s14, %s118_s28  }
  0x14   : > { %s1144_s5 = sadd.s32 (!%p185_p10), 2, %s1436_s4  ;;  %p225_p0 = scmp.lt.s32.totalorder (!%p185_p10), %s1436_s4, 5  ;;  %v256_v22 = vld [vmem:[%s1564_s0] sm:$0xff] (!%p185_p10)  ;;  %v1121_v23 = vld [vmem:[%s1564_s0 + $0x28] sm:$0xff] (!%p185_p10)  ;;  %vm435_vm5 = vcmask (!%p185_p10), 1031168   ;;  %vm799_vm6 = vcmask (!%p185_p10), 998400  }
  0x15   : > { %p236_p13 = scmp.lt.s32.totalorder (!%p185_p10), %s1144_s5, 5  ;;  %s1335_s23 = smov (!%p185_p10), 124   ;;  %v1109_v31 = vld [vmem:[%s1564_s0 + $0x10] sm:$0xff] (!%p185_p10)  ;;  %vm526_vm7 = vcmask (!%p185_p10), 1022976   ;;  %vm890_vm8 = vcmask (!%p185_p10), 990208   ;;  %v1113_v41 = vld [vmem:[%s1564_s0 + $0x18] sm:$0xff] (!%p185_p10) }
  0x16   : > { %s1336_s22 = smov (!%p185_p10), 127   ;;  %v1125_v34 = vld [vmem:[%s1564_s0 + $0x30] sm:$0xff] (!%p185_p10)  ;;  %v1129_v45 = vld [vmem:[%s1564_s0 + $0x38] sm:$0xff] (!%p185_p10) }
  0x19   : > { %s224_s6 = scalar_select %p223_p12, %s1321_s16, 1 }
  0x1a   : > { %s1590_s5 = smov (!%p236_p13, %s1144_s5), 5 }
  0x1b   : > { %s1159_s7 = smul.u32 6, %s224_s6  ;;  %s1339_s6 = smov 126  }
  0x1c   : > { %s226_s8 = scalar_select %p225_p0, %s1436_s4, 5 }
  0x1d   : > { %s239_s9 = sadd.s32 %s1159_s7, %s1590_s5  ;;  %s1338_s5 = smov 123  }
  0x1e   : > { %s1100_s10 = sshll.u32 %s239_s9, 1  ;;  %s228_s11 = sadd.s32 %s1159_s7, %s226_s8 }
  0x1f   : > { %s241_s24 = scalar_lea.vmem %s1566_s2, %s1100_s10  ;;  %s1098_s15 = sshll.u32 %s228_s11, 1 }
  0x20   : > { %v246_v0 = vld [vmem:[%s241_s24] sm:$0x3]  ;;  %s230_s29 = scalar_lea.vmem %s1565_s1, %s1098_s15  ;;  %s1340_s7 = smov 122  }
  0x21   : > { %615 = vrot.lane.b32.xlu1 %v246_v0, %s1335_s23  ;;  %264 = vrot.lane.b32.xlu0 %v246_v0, %s1336_s22  ;;  %v1101_v1 = vld.sshfl [vmem:[%s230_s29] sm:$0x33 pattern:$0x76325410]  ;;  %s1341_s8 = smov 125   ;;  %s1342_s9 = smov 121  }
  0x22   : > { %v255_v3 = vcombine.high %v1101_v1, %v1101_v1  ;;  %s1135_s10 = sshll.u32 %s1321_s16, 2  ;;  %s1343_s29 = smov [#allocation2]  }
  0x23   : > { %s988_s11 = sadd.s32 %s1135_s10, %s1436_s4 }
  0x24   : > { %s1136_s20 = sshll.u32 %s988_s11, 7 }
  0x25   : > { %611 = vrot.lane.b32.xlu1 %v1101_v1, %s1335_s23  ;;  %260 = vrot.lane.b32.xlu0 %v1101_v1, %s1336_s22  ;;  %s1511_s28 = scalar_lea.hbm %s1567_s3, %s1136_s20 }
  0x29   : > { %613 = vrot.lane.b32.xlu1 %v255_v3, %s1335_s23  ;;  %262 = vrot.lane.b32.xlu0 %v255_v3, %s1336_s22  ;;  %s219_s22 = sand.u32 1, %s1309_s13  }
  0x2a   : > { %s1096_s23 = sshll.u32 %s219_s22, 4  ;;  %s976_s16 = scalar_lea.sflag [#allocation3], %s219_s22 }
  0x2b   : > { %s221_s21 = scalar_lea.vmem [#allocation2], %s1096_s23 }
  0x2c   : > { %s992_s24 = sshll.u32 %s221_s21, 4  ;;  %s1513_s24 = int_to_ptr.vmem [resolvable:$true] %s992_s24 }
  0x2d   : > { %706 = vrot.lane.b32.xlu1 %v246_v0, %s1338_s5  ;;  %704 = vrot.lane.b32.xlu0 %v255_v3, %s1338_s5  ;;  %s1239_s4 = scalar_lea.vmem %s1513_s24, 256 }
  0x2e   : > { %p1240_p1 = scmp.ne.s32.totalorder %s1513_s24, %s1239_s4 }
  0x30   : > { %p1241_p2 = pnand %p1240_p1, %p1415_p3 }
  0x31   : > { %431 = vrot.lane.b32.xlu1 %v255_v3, %s1339_s6  ;;  %702 = vrot.lane.b32.xlu0 %v1101_v1, %s1338_s5  ;;  %s1243_s5 = sshll.u32 %s1343_s29, 4  ;;  %s1244_s5 = int_to_ptr.vmem [resolvable:$false] %s1243_s5 }
  0x32   : > { %p1242_p4 = pneg %p1241_p2  ;;  %p1246_p5 = scmp.lt.s32.totalorder %s1513_s24, %s1244_s5 }
  0x35   : > { %795 = vrot.lane.b32.xlu1 %v255_v3, %s1340_s7  ;;  %433 = vrot.lane.b32.xlu0 %v246_v0, %s1339_s6 }
  0x39   : > { %429 = vrot.lane.b32.xlu1 %v1101_v1, %s1339_s6  ;;  %797 = vrot.lane.b32.xlu0 %v246_v0, %s1340_s7  ;;  %s1245_s6 = scalar_lea.vmem %s1244_s5, 512 }
  0x3a   : > { %p1247_p6 = scmp.lt.s32.totalorder %s1245_s6, %s1239_s4 }
  0x3c   : > { %p1248_p7 = por %p1247_p6, %p1246_p5 }
  0x3d   : > { %522 = vrot.lane.b32.xlu1 %v255_v3, %s1341_s8  ;;  %793 = vrot.lane.b32.xlu0 %v1101_v1, %s1340_s7 }
  0x3e   : > { %p1249_p9 = pnand %p1248_p7, %p1242_p4 }
  0x41   : > { %886 = vrot.lane.b32.xlu1 %v255_v3, %s1342_s9  ;;  %524 = vrot.lane.b32.xlu0 %v246_v0, %s1341_s8 }
  0x45   : > { %520 = vrot.lane.b32.xlu1 %v1101_v1, %s1341_s8  ;;  %888 = vrot.lane.b32.xlu0 %v246_v0, %s1342_s9 }
  0x49   : > { %884 = vrot.lane.b32.xlu0 %v1101_v1, %s1342_s9 }
  0x93   : > { %v616_v4 = vpop.permute.xlu1 %615  ;;  %v265_v5 = vpop.permute.xlu0 %264 }
  0x97   : > { %v612_v6 = vpop.permute.xlu1 %611  ;;  %v261_v7 = vpop.permute.xlu0 %260 }
  0x9b   : > { %v614_v8 = vpop.permute.xlu1 %613  ;;  %v263_v9 = vpop.permute.xlu0 %262 }
  0x9c   : > { %v268_v10 = vsel %vm266_vm0, %v263_v9, %v265_v5  ;;  %v619_v11 = vsel %vm617_vm1, %v614_v8, %v616_v4  ;;  %v267_v12 = vsel %vm266_vm0, %v261_v7, %v263_v9  ;;  %v618_v13 = vsel %vm617_vm1, %v612_v6, %v614_v8 }
  0x9d   : > { %1103 = vmatprep.subr.msk.mxu1 %vm273_vm2, %v268_v10  ;;  %1118 = vmatprep.subr.msk.mxu0 %vm273_vm2, %v619_v11 }
  0x9e   : > { %1104 = vmatpush1.msk.msra.mxu1 %vm273_vm2, %v267_v12  ;;  %1119 = vmatpush1.msk.msra.mxu0 %vm273_vm2, %v618_v13 }
  0x9f   : > { %v707_v16 = vpop.permute.xlu1 %706  ;;  %v705_v17 = vpop.permute.xlu0 %704  ;;  %1105 = vmatmul.mubr.msk.f32.vlgmr.msra.gmra.mrb[0].mxu1 %vm269_vm3, %v1102_v14  ;;  %1120 = vmatmul.mubr.msk.f32.vlgmr.msra.gmra.mrb[0].mxu0 %vm269_vm3, %v1117_v15 }
  0xa0   : > { %v710_v18 = vsel %vm708_vm4, %v705_v17, %v707_v16  ;;  %1106 = vmatprep.subr.msk.mxu1 %vm273_vm2, %v255_v3  ;;  %420 = vmatprep.mubr.f32.mxu1 %v1337_v2 }
  0xa1   : > { %1122 = vmatprep.subr.msk.mxu0 %vm273_vm2, %v710_v18  ;;  %1107 = vmatpush1.msk.msra.mxu1 %vm273_vm2, %v1101_v1 }
  0xa2   : > { %782 = vmatprep.mubr.f32.mxu0 %v1337_v2 }
  0xa3   : > { %v432_v19 = vpop.permute.xlu1 %431  ;;  %v703_v20 = vpop.permute.xlu0 %702 }
  0xa4   : > { %v709_v21 = vsel %vm708_vm4, %v703_v20, %v705_v17 }
  0xa5   : > { %1123 = vmatpush1.msk.msra.mxu0 %vm273_vm2, %v709_v21 }
  0xa7   : > { %v796_v24 = vpop.permute.xlu1 %795  ;;  %v434_v25 = vpop.permute.xlu0 %433  ;;  %1108 = vmatmul.mubr.msk.f32.vlgmr.msra.gmra.mrb[0].mxu1 %vm269_vm3, %v256_v22  ;;  %1124 = vmatmul.mubr.msk.f32.vlgmr.msra.gmra.mrb[0].mxu0 %vm269_vm3, %v1121_v23 }
  0xa8   : > { %v437_v26 = vsel %vm435_vm5, %v432_v19, %v434_v25  ;;  %509 = vmatprep.mubr.f32.mxu1 %v1337_v2  ;;  %873 = vmatprep.mubr.f32.mxu0 %v1337_v2 }
  0xa9   : > { %1110 = vmatprep.subr.msk.mxu1 %vm273_vm2, %v437_v26 }
  0xab   : > { %v430_v27 = vpop.permute.xlu1 %429  ;;  %v798_v28 = vpop.permute.xlu0 %797 }
  0xac   : > { %v436_v29 = vsel %vm435_vm5, %v430_v27, %v432_v19  ;;  %v801_v30 = vsel %vm799_vm6, %v796_v24, %v798_v28 }
  0xad   : > { %1111 = vmatpush1.msk.msra.mxu1 %vm273_vm2, %v436_v29  ;;  %1126 = vmatprep.subr.msk.mxu0 %vm273_vm2, %v801_v30 }
  0xaf   : > { %v523_v32 = vpop.permute.xlu1 %522  ;;  %v794_v33 = vpop.permute.xlu0 %793  ;;  %1112 = vmatmul.mubr.msk.f32.vlgmr.msra.gmra.mrb[0].mxu1 %vm269_vm3, %v1109_v31 }
  0xb0   : > { %v800_v35 = vsel %vm799_vm6, %v794_v33, %v796_v24  ;;  %600 = vmatprep.mubr.f32.mxu1 %v1337_v2 }
  0xb1   : > { %1127 = vmatpush1.msk.msra.mxu0 %vm273_vm2, %v800_v35 }
  0xb2   : > { %1128 = vmatmul.mubr.msk.f32.vlgmr.msra.gmra.mrb[0].mxu0 %vm269_vm3, %v1125_v34 }
  0xb3   : > { %v887_v36 = vpop.permute.xlu1 %886  ;;  %v525_v37 = vpop.permute.xlu0 %524  ;;  %964 = vmatprep.mubr.f32.mxu0 %v1337_v2 }
  0xb4   : > { %v528_v38 = vsel %vm526_vm7, %v523_v32, %v525_v37 }
  0xb5   : > { %1114 = vmatprep.subr.msk.mxu1 %vm273_vm2, %v528_v38 }
  0xb7   : > { %v521_v39 = vpop.permute.xlu1 %520  ;;  %v889_v40 = vpop.permute.xlu0 %888 }
  0xb8   : > { %v527_v42 = vsel %vm526_vm7, %v521_v39, %v523_v32  ;;  %v892_v43 = vsel %vm890_vm8, %v887_v36, %v889_v40 }
  0xb9   : > { %1115 = vmatpush1.msk.msra.mxu1 %vm273_vm2, %v527_v42  ;;  %1130 = vmatprep.subr.msk.mxu0 %vm273_vm2, %v892_v43 }
  0xba   : > { %1116 = vmatmul.mubr.msk.f32.vlgmr.msra.gmra.mrb[0].mxu1 %vm269_vm3, %v1113_v41 }
  0xbb   : > { %v885_v44 = vpop.permute.xlu0 %884 }
  0xbc   : > { %v891_v46 = vsel %vm890_vm8, %v885_v44, %v887_v36 }
  0xbd   : > { %1131 = vmatpush1.msk.msra.mxu0 %vm273_vm2, %v891_v46 }
  0xbe   : > { %1132 = vmatmul.mubr.msk.f32.vlgmr.msra.gmra.mrb[0].mxu0 %vm269_vm3, %v1129_v45 }
 0x18d   : > { %v602_v47 = vpop.f32.mrb[0].mxu1 }
 0x18e   : > { %v604_v48 = vpop.f32.mrb[1].mxu1 }
 0x191   : > { %v966_v49 = vpop.f32.mrb[0].mxu0 }
 0x192   : > { %v1145_v50 = vadd.f32 %v966_v49, %v602_v47  ;;  %v968_v51 = vpop.f32.mrb[1].mxu0 }
 0x193   : > { %v1146_v52 = vadd.f32 %v968_v51, %v604_v48 }
 0x194   : > { %973 = vst [vmem:[%s221_s21] sm:$0xff] %v1145_v50 }
 0x195   : > { %974 = vst [vmem:[%s221_s21 + $0x8] sm:$0xff] %v1146_v52 }
 0x196   : > { %1252 = shalt.err (!%p1249_p9)
}
 0x197   : > { %s1253_s7 = scalar_lea.hbm %s1511_s28, 256  ;;  %s1257_s22 = scalar_lea.hbm %s1567_s3, 1024 }
 0x198   : > { %p1254_p10 = scmp.ne.s32.totalorder %s1511_s28, %s1253_s7  ;;  %p1258_p13 = scmp.lt.u32.totalorder %s1511_s28, %s1567_s3 }
 0x199   : > { %p1259_p0 = scmp.lt.u32.totalorder %s1257_s22, %s1253_s7  ;;  %p1261_p2 = scmp.lt.u32.totalorder %s1253_s7, %s1511_s28 }
 0x19a   : > { %p1255_p11 = pnand %p1254_p10, %p1415_p3 }
 0x19b   : > { %p1260_p1 = por %p1259_p0, %p1258_p13 }
 0x19c   : > { %p1256_p12 = pneg %p1255_p11 }
 0x19d   : > { %p1262_p4 = por %p1261_p2, %p1260_p1 }
 0x19f   : > { %p1263_p5 = pnand %p1262_p4, %p1256_p12 }
 0x1a1   : > { %1266 = shalt.err (!%p1263_p5)
}
 0x1a2   : > { %1160 = dma.vmem_to_hbm [thread:$0]  (%p1415_p3), %s1513_s24, 256, %s1511_s28, %s976_s16  }
 0x1a3 PF: > { %p1166_p6 = scmp.ge.s32.totalorder %s1333_s19, 2  ;;  %s1004_s11 = sand.u32 1, %s1305_s12  }
 0x1a4   : > { %s1005_s20 = scalar_lea.sflag [#allocation3], %s1004_s11 }
 0x1a5   : > { %p1163_p7 = pnand %p1166_p6, %p1424_p8 }
 0x1a7   : > { %1300 = dma.done.wait (!%p1163_p7), %s1005_s20, 256  }
 0x1a8   : > { %1302 = vsyncadd (!%p1163_p7), %s1005_s20, 4294967040  ;;  %s16_s19 = sadd.s32 1, %s1333_s19   ;;  %s1574_s25 = sld [smem:[#allocation5_spill]] }
 0x1a9   : > { %p13_p9 = scmp.ge.s32.totalorder %s16_s19, 6   ;;  %s1575_s21 = sld [smem:[#allocation6_spill]] }
 0x1aa   : > { %s1576_s12 = smov %s1309_s13  ;;  %s1577_s13 = smov %s1313_s14 }
 0x1ab   : > { %s1578_s14 = smov %s1433_s30  ;;  %s1579_s15 = smov %s1325_s17 }
 0x1ac   : > { %s1580_s16 = smov %s1329_s18  ;;  %15 = sbr.rel (!%p13_p9) target bundleno = 5 (0x5), region = 77 }
 0x1ae   : > { %s1581_s17 = smov %s1574_s25 }
 0x1af   : > { %s1582_s18 = smov %s1575_s21 }
 0x1b3   :  { %1010 = vsyncpa [#allocation3], 1 }
 0x1b4   :  { %1012 = vsyncpa [#allocation3 + $0x1], 1 }

</bundles_post_ra>
